<compile_context>
chip_gen: v6e
topology: v6e:2x2x1
jax: 0.10.0
libtpu: 0.0.40
codegen_flags: <defaults>
</compile_context>

<pallas_src>
import numpy as np
import jax
import jax.numpy as jnp
from jax.experimental import pallas as pl
from jax.experimental.pallas import tpu as pltpu


def _round_up(x: int, m: int) -> int:
    return ((x + m - 1) // m) * m


def _dct_matrix_np(n: int) -> np.ndarray:
    """Orthonormal DCT-II matrix D of shape (n, n): y = D @ x."""
    k = np.arange(n)[:, None].astype(np.float64)
    m = np.arange(n)[None, :].astype(np.float64)
    d = np.cos(np.pi * (2.0 * m + 1.0) * k / (2.0 * n))
    scale = np.full((n, 1), np.sqrt(2.0 / n))
    scale[0, 0] = np.sqrt(1.0 / n)
    return d * scale


def _dct_kernel(x_ref, dt_ref, o_ref):
    # x_ref: (tm, Ceff) tile of (packed) rows, dt_ref: (Ceff, Ceff) = D^T
    # (block-diagonal when rows are packed), o_ref: (tm, Ceff).
    o_ref[...] = jnp.dot(
        x_ref[...], dt_ref[...], preferred_element_type=jnp.float32
    ).astype(o_ref.dtype)


def patch_dct(x: jnp.ndarray, *, tm: int = 512) -> jnp.ndarray:
    """DCT-II (norm='ortho') along the channel dim of x with shape (B, L, C)."""
    B, L, C = x.shape
    M = B * L
    out_dtype = x.dtype
    dt_dtype = jnp.bfloat16 if x.dtype == jnp.bfloat16 else jnp.float32

    # --- Lane-dense packing for small C ------------------------------------
    # Fold r consecutive rows into one 256-wide row (free contiguous reshape)
    # and multiply by a block-diagonal basis: full 128/256-lane output width
    # (no masked vst, full MXU width). r is shrunk until it divides M so no
    # padded copy of x is ever needed.
    if C < 128 and 128 % C == 0:          # C is a power of two < 128
        r = 256 // C
        while r > 1 and M % r != 0:
            r //= 2
    else:
        r = 1
    Ceff = r * C

    dt_np = _dct_matrix_np(C).T           # (C, C): y_row = x_row @ D^T
    if r > 1:
        dt_np = np.kron(np.eye(r), dt_np)  # block-diagonal (Ceff, Ceff)
    d_t = jnp.asarray(dt_np, dtype=dt_dtype)

    # --- Tile sizing under an explicit VMEM budget --------------------------
    M_eff = M // r                         # packed row count (exact)
    x_item = jnp.dtype(x.dtype).itemsize
    dt_item = jnp.dtype(dt_dtype).itemsize

    budget = 48 * 1024 * 1024              # fits v7x's 64 MiB VMEM
    fixed = 2 * Ceff * Ceff * dt_item      # D^T (double-buffered)
    per_row = 4 * Ceff * x_item            # (in + out) x double-buffer
    avail = max(budget - fixed, 8 * per_row)
    tm_cap = max(8, (avail // per_row) // 8 * 8)
    tm_eff = max(8, min(tm, tm_cap, _round_up(M_eff, 8)))
    tm_eff = _round_up(tm_eff, 8)

    # Ragged grid: Pallas clips the last block (OOB writes are dropped), so
    # no row padding / slicing passes over HBM are required.
    grid = (pl.cdiv(M_eff, tm_eff),)
    vmem_bytes = int(min(max(fixed + 4 * tm_eff * Ceff * x_item + (2 << 20),
                             16 << 20), 64 << 20))

    x_packed = x.reshape(M_eff, Ceff)      # contiguous, free

    out_packed = pl.pallas_call(
        _dct_kernel,
        out_shape=jax.ShapeDtypeStruct((M_eff, Ceff), out_dtype),
        grid_spec=pltpu.PrefetchScalarGridSpec(
            num_scalar_prefetch=0,
            grid=grid,
            in_specs=[
                pl.BlockSpec((tm_eff, Ceff), lambda i: (i, 0)),
                pl.BlockSpec((Ceff, Ceff), lambda i: (0, 0)),
            ],
            out_specs=pl.BlockSpec((tm_eff, Ceff), lambda i: (i, 0)),
        ),
        compiler_params=pltpu.CompilerParams(
            dimension_semantics=("parallel",),
            vmem_limit_bytes=vmem_bytes,
        ),
    )(x_packed, d_t)

    return out_packed.reshape(B, L, C)


def _reference_dct(x: jnp.ndarray) -> jnp.ndarray:
    """Pure-JAX reference: orthonormal DCT-II along the last axis (f32)."""
    B, L, C = x.shape
    d = jnp.asarray(_dct_matrix_np(C), dtype=jnp.float32)
    return jnp.einsum("blc,kc->blk", x.astype(jnp.float32), d)


if __name__ == "__main__":
    key = jax.random.PRNGKey(0)
    k1, k2, k3 = jax.random.split(key, 3)

    # Small-C case (lane-dense block-diagonal packing, ragged single block).
    B, L, C = 2, 8, 32
    x = jax.random.normal(k1, (B, L, C), dtype=jnp.float32)
    y = jax.block_until_ready(patch_dct(x))
    np.testing.assert_allclose(
        np.asarray(y.astype(jnp.float32)),
        np.asarray(_reference_dct(x)),
        rtol=1e-3, atol=1e-3)

    # Lane-aligned C with a ragged row count -> multi-step grid, clipped tail.
    B2, L2, C2 = 3, 342, 256    # M = 1026 rows, not a multiple of the tile
    x2 = jax.random.normal(k2, (B2, L2, C2), dtype=jnp.float32)
    y2 = jax.block_until_ready(patch_dct(x2))
    np.testing.assert_allclose(
        np.asarray(y2.astype(jnp.float32)),
        np.asarray(_reference_dct(x2)),
        rtol=1e-3, atol=1e-3)

    # Small C where M is not divisible by the full packing factor (r shrinks).
    B3, L3, C3 = 2, 9, 32       # M = 18 -> r falls back from 8 to 2
    x3 = jax.random.normal(k3, (B3, L3, C3), dtype=jnp.float32)
    y3 = jax.block_until_ready(patch_dct(x3))
    np.testing.assert_allclose(
        np.asarray(y3.astype(jnp.float32)),
        np.asarray(_reference_dct(x3)),
        rtol=1e-3, atol=1e-3)

    # bf16 path (basis built in bf16, f32 MXU accumulation).
    xb = x.astype(jnp.bfloat16)
    yb = jax.block_until_ready(patch_dct(xb))
    np.testing.assert_allclose(
        np.asarray(yb.astype(jnp.float32)),
        np.asarray(_reference_dct(xb)),
        rtol=5e-2, atol=5e-2)

    print("KERNEL_OK")
</pallas_src>

<mosaic_0001>
module attributes {stable_mosaic.version = 11 : i64} {
  func.func @_dct_kernel(%arg0: i32, %arg1: memref<8x256xf32, #tpu.memory_space<vmem>>, %arg2: memref<256x256xf32, #tpu.memory_space<vmem>>, %arg3: memref<8x256xf32, #tpu.memory_space<vmem>>) attributes {dimension_semantics = [#tpu.dimension_semantics<parallel>], iteration_bounds = array<i64: 1>, scalar_prefetch = 0 : i64, scratch_operands = 0 : i64, tpu.core_type = #tpu.core_type<tc>, window_params = [{transform_indices = @transform_0, window_bounds = array<i64: 8, 256>}, {pipeline_mode = #tpu.pipeline_mode<synchronous>, transform_indices = @transform_1, window_bounds = array<i64: 256, 256>}, {transform_indices = @transform_2, window_bounds = array<i64: 8, 256>}]} {
    %c0 = arith.constant 0 : index
    %c0_0 = arith.constant 0 : index
    %0 = vector.load %arg1[%c0, %c0_0] : memref<8x256xf32, #tpu.memory_space<vmem>>, vector<8x256xf32>
    %c0_1 = arith.constant 0 : index
    %c0_2 = arith.constant 0 : index
    %1 = vector.load %arg2[%c0_1, %c0_2] : memref<256x256xf32, #tpu.memory_space<vmem>>, vector<256x256xf32>
    %cst = arith.constant dense<0.000000e+00> : vector<8x256xf32>
    %2 = tpu.matmul %0, %1, %cst {dimension_numbers = #tpu.dot_dimension_numbers<[1], [0], [0], [1], [0, 0, 1, 1], [], []>} : vector<8x256xf32>, vector<256x256xf32>, vector<8x256xf32> -> vector<8x256xf32>
    %c0_3 = arith.constant 0 : index
    %c0_4 = arith.constant 0 : index
    %3 = vector.load %arg3[%c0_3, %c0_4] : memref<8x256xf32, #tpu.memory_space<vmem>>, vector<8x256xf32>
    tpu.vector_store %arg3[%c0_3, %c0_4], %2 {strides = array<i32>} : memref<8x256xf32, #tpu.memory_space<vmem>>, vector<8x256xf32>,
    return
  }
  func.func @transform_0(%arg0: i32) -> (i32, i32) {
    %c0_i32 = arith.constant 0 : i32
    %c0_i32_0 = arith.constant 0 : i32
    return %arg0, %c0_i32 : i32, i32
  }
  func.func @transform_1(%arg0: i32) -> (i32, i32) {
    %c0_i32 = arith.constant 0 : i32
    %c0_i32_0 = arith.constant 0 : i32
    %c0_i32_1 = arith.constant 0 : i32
    return %c0_i32, %c0_i32_0 : i32, i32
  }
  func.func @transform_2(%arg0: i32) -> (i32, i32) {
    %c0_i32 = arith.constant 0 : i32
    %c0_i32_0 = arith.constant 0 : i32
    return %arg0, %c0_i32 : i32, i32
  }
}

</mosaic_0001>

<bundles_post_ra>
// kernel: tpu_custom_call.1
= control target key start
LH: loop header
LB: loop body
LE: loop exit
PB: predicated region body
PF: predicated region fallthrough
CT: control target
= control target key end

     0   :  { %7 = vsyncpa [#allocation3], 0  ;;  %s379_s0 = inlined_call_operand.hbm [shape: f32[2,256], index: 0, kind: input, shape index: {}]   ;;  %s380_s1 = inlined_call_operand.hbm [shape: f32[256,256], index: 1, kind: input, shape index: {}]   ;;  %s381_s2 = inlined_call_operand.hbm [shape: f32[2,256], index: 2, kind: output, shape index: {}]  }
   0x1   :  { %8 = vsyncpa [#allocation6], 0 }
   0x2   :  { %9 = vsyncpa [#allocation4], 0 }
   0x3   :  { %14 = vsyncadd [#allocation3], 192  ;;  %s329_s9 = smov [#allocation2]  }
   0x4   :  { %s15_s10 = sshll.u32 %s329_s9, 4  ;;  %s16_s10 = int_to_ptr.vmem [resolvable:$true] %s15_s10 }
   0x5   :  { %s271_s11 = scalar_lea.vmem %s16_s10, 64  ;;  %s275_s12 = scalar_lea.vmem %s16_s10, 256 }
   0x6   :  { %p272_p0 = scmp.ne.s32.totalorder %s16_s10, %s271_s11  ;;  %p276_p1 = scmp.lt.s32.totalorder %s16_s10, %s16_s10 }
   0x7   :  { %p277_p2 = scmp.lt.s32.totalorder %s275_s12, %s271_s11 }
   0x9   :  { %p278_p3 = por %p277_p2, %p276_p1 }
   0xb   :  { %p279_p4 = pnand %p278_p3, %p272_p0 }
   0xd   :  { %282 = shalt.err (!%p279_p4)
}
   0xe   :  { %s330_s13 = smov 64   ;;  %s331_s14 = smov 4  }
   0xf   :  { %21 = dma.hbm_to_vmem [thread:$0]  %s379_s0, 64, %s16_s10, [#allocation3], %s330_s13, %s330_s13, %s331_s14  }
  0x10   :  { %s332_s17 = smov [#allocation5]  }
  0x11   :  { %s27_s18 = sshll.u32 %s332_s17, 4  ;;  %s28_s18 = int_to_ptr.vmem [resolvable:$true] %s27_s18 }
  0x12   :  { %s291_s19 = scalar_lea.vmem %s28_s18, 8192  ;;  %p296_p6 = scmp.lt.s32.totalorder %s28_s18, %s28_s18 }
  0x13   :  { %p292_p5 = scmp.ne.s32.totalorder %s28_s18, %s291_s19  ;;  %p297_p7 = scmp.lt.s32.totalorder %s291_s19, %s291_s19 }
  0x15   :  { %p298_p8 = por %p297_p7, %p296_p6 }
  0x17   :  { %p299_p9 = pnand %p298_p8, %p292_p5 }
  0x19   :  { %302 = shalt.err (!%p299_p9)
}
  0x1a   :  { %s333_s20 = smov 256   ;;  %s334_s21 = smov 16  }
  0x1b   :  { %33 = dma.hbm_to_vmem [thread:$0]  %s380_s1, 8192, %s28_s18, [#allocation6], %s333_s20, %s333_s20, %s334_s21  }
  0x1c   :  { %323 = dma.done.wait [#allocation3], 256  }
  0x1d   :  { %324 = vsyncadd [#allocation3], 4294967040 }
  0x1e   :  { %325 = dma.done.wait [#allocation6], 8192  }
  0x1f   :  { %326 = vsyncadd [#allocation6], 4294959104  ;;  %v75_v0 = vld [vmem:[#allocation5 + $0xf8] sm:$0xff]  ;;  %v74_v1 = vld [vmem:[#allocation5 + $0xf0] sm:$0xff]  ;;  %v335_v15 = vmov 1983009808   ;;  %v117_v17 = vlaneseq }
  0x20   :  { %v73_v2 = vld [vmem:[#allocation5 + $0xe8] sm:$0xff]  ;;  %132 = vmatprep.subr.mxu0 %v75_v0  ;;  %v72_v3 = vld [vmem:[#allocation5 + $0xe0] sm:$0xff]  ;;  %v71_v4 = vld [vmem:[#allocation5 + $0xd8] sm:$0xff]  ;;  %v115_v16 = vunpack.c.l.s4 %v335_v15 }
  0x21   :  { %133 = vmatpush1.msra.mxu0 %v74_v1  ;;  %v70_v5 = vld [vmem:[#allocation5 + $0xd0] sm:$0xff]  ;;  %v69_v6 = vld [vmem:[#allocation5 + $0xc8] sm:$0xff]  ;;  %v68_v7 = vld [vmem:[#allocation5 + $0xc0] sm:$0xff]  ;;  %v118_v23 = vshrl.u32 %v117_v17, 7 }
  0x22   :  { %134 = vmatprep.subr.mxu0 %v73_v2  ;;  %v67_v8 = vld [vmem:[#allocation5 + $0xb8] sm:$0xff]  ;;  %v66_v9 = vld [vmem:[#allocation5 + $0xb0] sm:$0xff]  ;;  %v65_v10 = vld [vmem:[#allocation5 + $0xa8] sm:$0xff]  ;;  %v116_v22 = vunpack.c.0.s8 %v115_v16 }
  0x23   :  { %135 = vmatpush1.msra.mxu0 %v72_v3  ;;  %v64_v11 = vld [vmem:[#allocation5 + $0xa0] sm:$0xff]  ;;  %v63_v12 = vld [vmem:[#allocation5 + $0x98] sm:$0xff]  ;;  %v62_v13 = vld [vmem:[#allocation5 + $0x90] sm:$0xff] }
  0x24   :  { %136 = vmatprep.subr.mxu0 %v71_v4  ;;  %v61_v14 = vld [vmem:[#allocation5 + $0x88] sm:$0xff]  ;;  %v60_v18 = vld [vmem:[#allocation5 + $0x80] sm:$0xff]  ;;  %v59_v19 = vld [vmem:[#allocation5 + $0x78] sm:$0xff]  ;;  %v361_v29 = vsub.s32 %v116_v22, %v118_v23 }
  0x25   :  { %137 = vmatpush1.msra.mxu0 %v70_v5  ;;  %v58_v20 = vld [vmem:[#allocation5 + $0x70] sm:$0xff]  ;;  %v57_v21 = vld [vmem:[#allocation5 + $0x68] sm:$0xff]  ;;  %v56_v24 = vld [vmem:[#allocation5 + $0x60] sm:$0xff] }
  0x26   :  { %138 = vmatprep.subr.mxu0 %v69_v6  ;;  %v55_v25 = vld [vmem:[#allocation5 + $0x58] sm:$0xff]  ;;  %v54_v26 = vld [vmem:[#allocation5 + $0x50] sm:$0xff]  ;;  %v53_v27 = vld [vmem:[#allocation5 + $0x48] sm:$0xff] }
  0x27   :  { %139 = vmatpush1.msra.mxu0 %v68_v7  ;;  %v52_v28 = vld [vmem:[#allocation5 + $0x40] sm:$0xff]  ;;  %v51_v30 = vld [vmem:[#allocation5 + $0x38] sm:$0xff]  ;;  %v363_v31 = vld.sshfl [vmem:[#allocation2] sm:$0xff pattern:$0x76325410] }
  0x28   :  { %140 = vmatprep.subr.mxu0 %v67_v8  ;;  %v50_v32 = vld [vmem:[#allocation5 + $0x30] sm:$0xff]  ;;  %v365_v33 = vld.sshfl [vmem:[#allocation2 + $0x8] sm:$0xff pattern:$0x76325410]  ;;  %v49_v34 = vld [vmem:[#allocation5 + $0x28] sm:$0xff] }
  0x29   :  { %141 = vmatpush1.msra.mxu0 %v66_v9  ;;  %v48_v35 = vld [vmem:[#allocation5 + $0x20] sm:$0xff]  ;;  %v47_v36 = vld [vmem:[#allocation5 + $0x18] sm:$0xff]  ;;  %v46_v37 = vld [vmem:[#allocation5 + $0x10] sm:$0xff]  ;;  %v129_v38 = vcombine.high %v363_v31, %v365_v33  ;;  %v128_v9 = vcombine.low %v363_v31, %v365_v33 }
  0x2a   :  { %142 = vmatprep.subr.mxu0 %v65_v10  ;;  %v45_v39 = vld [vmem:[#allocation5 + $0x8] sm:$0xff]  ;;  %v44_v40 = vld [vmem:[#allocation5] sm:$0xff]  ;;  %v107_v41 = vld [vmem:[#allocation5 + $0x1f8] sm:$0xff] }
  0x2b   :  { %143 = vmatpush1.msra.mxu0 %v64_v11  ;;  %196 = vmatprep.mubr.f32.mxu0 %v129_v38  ;;  %v106_v42 = vld [vmem:[#allocation5 + $0x1f0] sm:$0xff]  ;;  %v105_v43 = vld [vmem:[#allocation5 + $0x1e8] sm:$0xff]  ;;  %v104_v44 = vld [vmem:[#allocation5 + $0x1e0] sm:$0xff] }
  0x2c   :  { %144 = vmatprep.subr.mxu0 %v63_v12  ;;  %v103_v45 = vld [vmem:[#allocation5 + $0x1d8] sm:$0xff]  ;;  %v102_v46 = vld [vmem:[#allocation5 + $0x1d0] sm:$0xff]  ;;  %v101_v47 = vld [vmem:[#allocation5 + $0x1c8] sm:$0xff] }
  0x2d   :  { %145 = vmatpush1.msra.mxu0 %v62_v13  ;;  %v100_v48 = vld [vmem:[#allocation5 + $0x1c0] sm:$0xff]  ;;  %v99_v49 = vld [vmem:[#allocation5 + $0x1b8] sm:$0xff]  ;;  %v98_v50 = vld [vmem:[#allocation5 + $0x1b0] sm:$0xff] }
  0x2e   :  { %146 = vmatprep.subr.mxu0 %v61_v14  ;;  %v97_v51 = vld [vmem:[#allocation5 + $0x1a8] sm:$0xff]  ;;  %v96_v52 = vld [vmem:[#allocation5 + $0x1a0] sm:$0xff]  ;;  %v95_v53 = vld [vmem:[#allocation5 + $0x198] sm:$0xff] }
  0x2f   :  { %147 = vmatpush1.msra.mxu0 %v60_v18  ;;  %v94_v54 = vld [vmem:[#allocation5 + $0x190] sm:$0xff]  ;;  %v93_v55 = vld [vmem:[#allocation5 + $0x188] sm:$0xff]  ;;  %v92_v56 = vld [vmem:[#allocation5 + $0x180] sm:$0xff] }
  0x30   :  { %148 = vmatprep.subr.mxu0 %v59_v19  ;;  %v91_v57 = vld [vmem:[#allocation5 + $0x178] sm:$0xff]  ;;  %v90_v58 = vld [vmem:[#allocation5 + $0x170] sm:$0xff]  ;;  %v89_v59 = vld [vmem:[#allocation5 + $0x168] sm:$0xff] }
  0x31   :  { %149 = vmatpush1.msra.mxu0 %v58_v20  ;;  %v88_v60 = vld [vmem:[#allocation5 + $0x160] sm:$0xff]  ;;  %v87_v61 = vld [vmem:[#allocation5 + $0x158] sm:$0xff]  ;;  %v86_v62 = vld [vmem:[#allocation5 + $0x150] sm:$0xff] }
  0x32   :  { %150 = vmatprep.subr.mxu0 %v57_v21  ;;  %v85_v63 = vld [vmem:[#allocation5 + $0x148] sm:$0xff]  ;;  %v84_v0 = vld [vmem:[#allocation5 + $0x140] sm:$0xff]  ;;  %v83_v1 = vld [vmem:[#allocation5 + $0x138] sm:$0xff] }
  0x33   :  { %151 = vmatpush1.msra.mxu0 %v56_v24  ;;  %v82_v2 = vld [vmem:[#allocation5 + $0x130] sm:$0xff]  ;;  %v81_v3 = vld [vmem:[#allocation5 + $0x128] sm:$0xff]  ;;  %v80_v4 = vld [vmem:[#allocation5 + $0x120] sm:$0xff] }
  0x34   :  { %152 = vmatprep.subr.mxu0 %v55_v25  ;;  %v79_v5 = vld [vmem:[#allocation5 + $0x118] sm:$0xff]  ;;  %v78_v6 = vld [vmem:[#allocation5 + $0x110] sm:$0xff]  ;;  %v77_v7 = vld [vmem:[#allocation5 + $0x108] sm:$0xff] }
  0x35   :  { %153 = vmatpush1.msra.mxu0 %v54_v26  ;;  %v76_v8 = vld [vmem:[#allocation5 + $0x100] sm:$0xff] }
  0x36   :  { %154 = vmatprep.subr.mxu0 %v53_v27 }
  0x37   :  { %155 = vmatpush1.msra.mxu0 %v52_v28 }
  0x38   :  { %156 = vmatprep.subr.mxu0 %v51_v30 }
  0x39   :  { %157 = vmatpush1.msra.mxu0 %v50_v32 }
  0x3a   :  { %158 = vmatprep.subr.mxu0 %v49_v34 }
  0x3b   :  { %159 = vmatpush1.msra.mxu0 %v48_v35 }
  0x3c   :  { %160 = vmatprep.subr.mxu0 %v47_v36 }
  0x3d   :  { %161 = vmatpush1.msra.mxu0 %v46_v37 }
  0x3e   :  { %162 = vmatprep.subr.mxu0 %v45_v39 }
  0x3f   :  { %163 = vmatpush1.msra.mxu0 %v44_v40 }
  0x40   :  { %164 = vmatprep.subr.mxu0 %v107_v41 }
  0x41   :  { %165 = vmatpush2.msra.mxu0 %v106_v42 }
  0x42   :  { %166 = vmatprep.subr.mxu0 %v105_v43 }
  0x43   :  { %167 = vmatpush2.msra.mxu0 %v104_v44 }
  0x44   :  { %168 = vmatprep.subr.mxu0 %v103_v45 }
  0x45   :  { %169 = vmatpush2.msra.mxu0 %v102_v46 }
  0x46   :  { %170 = vmatprep.subr.mxu0 %v101_v47 }
  0x47   :  { %171 = vmatpush2.msra.mxu0 %v100_v48 }
  0x48   :  { %172 = vmatprep.subr.mxu0 %v99_v49 }
  0x49   :  { %173 = vmatpush2.msra.mxu0 %v98_v50 }
  0x4a   :  { %174 = vmatprep.subr.mxu0 %v97_v51 }
  0x4b   :  { %175 = vmatpush2.msra.mxu0 %v96_v52 }
  0x4c   :  { %176 = vmatprep.subr.mxu0 %v95_v53 }
  0x4d   :  { %177 = vmatpush2.msra.mxu0 %v94_v54 }
  0x4e   :  { %178 = vmatprep.subr.mxu0 %v93_v55 }
  0x4f   :  { %179 = vmatpush2.msra.mxu0 %v92_v56 }
  0x50   :  { %180 = vmatprep.subr.mxu0 %v91_v57 }
  0x51   :  { %181 = vmatpush2.msra.mxu0 %v90_v58 }
  0x52   :  { %182 = vmatprep.subr.mxu0 %v89_v59 }
  0x53   :  { %183 = vmatpush2.msra.mxu0 %v88_v60 }
  0x54   :  { %184 = vmatprep.subr.mxu0 %v87_v61 }
  0x55   :  { %185 = vmatpush2.msra.mxu0 %v86_v62 }
  0x56   :  { %186 = vmatprep.subr.mxu0 %v85_v63 }
  0x57   :  { %187 = vmatpush2.msra.mxu0 %v84_v0 }
  0x58   :  { %188 = vmatprep.subr.mxu0 %v83_v1 }
  0x59   :  { %189 = vmatpush2.msra.mxu0 %v82_v2 }
  0x5a   :  { %190 = vmatprep.subr.mxu0 %v81_v3 }
  0x5b   :  { %191 = vmatpush2.msra.mxu0 %v80_v4 }
  0x5c   :  { %192 = vmatprep.subr.mxu0 %v79_v5 }
  0x5d   :  { %193 = vmatpush2.msra.mxu0 %v78_v6 }
  0x5e   :  { %194 = vmatprep.subr.mxu0 %v77_v7 }
  0x5f   :  { %195 = vmatpush2.msra.mxu0 %v76_v8 }
  0x60   :  { %197 = vmatmul.mubr.f32.vlgmr.msra.gmra.mxu0 %v128_v9 }
 0x120   :  { %v198_v10 = vpop.f32.mrf.mxu0 }
 0x122   :  { %v200_v11 = vpop.f32.mrf.mxu0 }
 0x123   :  { %v205_v12 = vcombine.low %v198_v10, %v200_v11  ;;  %v206_v13 = vcombine.high %v198_v10, %v200_v11 }
 0x125   :  { %v213_v14 = vrot.slane %v205_v12, %v361_v29  ;;  %v220_v15 = vrot.slane %v206_v13, %v361_v29  ;;  %249 = vst.sshfl [vmem:[#allocation7] sm:$0x33 pattern:$0x76325410] %v205_v12 }
 0x126   :  { %250 = vst.sshfl [vmem:[#allocation7 + $0x8] sm:$0x33 pattern:$0x76325410] %v206_v13 }
 0x127   :  { %v221_v16 = vcombine.high %v213_v14, %v213_v14  ;;  %v222_v17 = vcombine.high %v220_v15, %v220_v15 }
 0x129   :  { %228 = vst [vmem:[#allocation7 + $0x4] sm:$0xf] %v221_v16  ;;  %230 = vst [vmem:[#allocation7 + $0xc] sm:$0xf] %v222_v17 }
 0x12a   :  { %235 = vsyncadd [#allocation4], 192  ;;  %s336_s0 = smov [#allocation7]  }
 0x12b   :  { %s236_s1 = sshll.u32 %s336_s0, 4  ;;  %s237_s1 = int_to_ptr.vmem [resolvable:$true] %s236_s1 }
 0x12c   :  { %s303_s24 = scalar_lea.vmem %s237_s1, 64  ;;  %s307_s25 = scalar_lea.vmem %s237_s1, 256 }
 0x12d   :  { %p304_p10 = scmp.ne.s32.totalorder %s237_s1, %s303_s24  ;;  %p308_p11 = scmp.lt.s32.totalorder %s237_s1, %s237_s1 }
 0x12e   :  { %p309_p12 = scmp.lt.s32.totalorder %s307_s25, %s303_s24 }
 0x130   :  { %p310_p13 = por %p309_p12, %p308_p11 }
 0x132   :  { %p311_p0 = pnand %p310_p13, %p304_p10 }
 0x134   :  { %314 = shalt.err (!%p311_p0)
}
 0x135   :  { %242 = dma.vmem_to_hbm [thread:$0]  %s237_s1, 64, %s381_s2, [#allocation4], %s330_s13, %s330_s13, %s331_s14  }
 0x136   :  { %327 = dma.done.wait [#allocation4], 256  }
 0x137   :  { %328 = vsyncadd [#allocation4], 4294967040 }
 0x138   :  { %246 = vsyncpa [#allocation3], 1 }
 0x139   :  { %247 = vsyncpa [#allocation6], 1 }
 0x13a   :  { %248 = vsyncpa [#allocation4], 1 }

</bundles_post_ra>
